<compile_context>
chip_gen: v6e
topology: v6e:2x2x1
jax: 0.10.0
libtpu: 0.0.40
codegen_flags: <defaults>
</compile_context>

<pallas_src>
import functools

import jax
import jax.numpy as jnp
from jax import lax
from jax.experimental import pallas as pl
from jax.experimental.pallas import tpu as pltpu


def _round_up(x, m):
    return (x + m - 1) // m * m


def _bce_tile(x, t):
    # Numerically stable BCE-with-logits (matches torch):
    #   loss = max(x, 0) - x*t + log1p(exp(-|x|))
    x = x.astype(jnp.float32)
    t = t.astype(jnp.float32)
    return jnp.maximum(x, 0.0) - x * t + jnp.log1p(jnp.exp(-jnp.abs(x)))


def _accumulate(x_ref, t_ref, m_ref, o_ref, acc_ref, *, inv_l, tl, l_total, mask_tail):
    k = pl.program_id(1)

    @pl.when(k == 0)
    def _():
        acc_ref[...] = jnp.zeros_like(acc_ref)

    loss = _bce_tile(x_ref[...], t_ref[...])          # (tb, tl) via broadcasting
    if m_ref is not None:
        loss = loss * m_ref[...].astype(jnp.float32)
    if mask_tail:
        # L not divisible by tl: zero the garbage tail columns of the last block.
        col = k * tl + lax.broadcasted_iota(jnp.int32, loss.shape, 1)
        loss = jnp.where(col < l_total, loss, 0.0)

    acc_ref[...] += jnp.sum(loss, axis=1, keepdims=True)   # lane reduce on the XLU

    @pl.when(k == pl.num_programs(1) - 1)
    def _():
        # TODO(synk): for tiny L a lane-dense (1, tb) output layout would avoid
        # masked vst.msk stores; at L>=128 the output is ~1/(3L) of traffic.
        o_ref[...] = acc_ref[...] * inv_l


def _kernel_mask(x_ref, t_ref, m_ref, o_ref, acc_ref, **kw):
    _accumulate(x_ref, t_ref, m_ref, o_ref, acc_ref, **kw)


def _kernel_nomask(x_ref, t_ref, o_ref, acc_ref, **kw):
    _accumulate(x_ref, t_ref, None, o_ref, acc_ref, **kw)


def _normalize_aux(arr, B, L):
    """Return (array, is_row). is_row => shape (1, L), broadcast over batch in-kernel."""
    arr = jnp.asarray(arr)
    if arr.dtype == jnp.bool_:
        arr = arr.astype(jnp.int8)          # 1 B/elem in HBM; upcast in-kernel
    if arr.ndim == 1 and arr.shape[0] == L:
        return arr.reshape(1, L), True
    if arr.shape == (1, L):
        return arr, True
    if arr.shape == (B, L):
        return arr, False
    # Rare fallback (scalar, (B,1), ...): materialize the broadcast.
    return jnp.broadcast_to(arr, (B, L)), False


def sigmoid_bce_loss(inputs, target, mask=None, *, tile_bytes=4 << 20):
    """Pallas equivalent of SigmoidBCELoss.forward. Returns shape (B,) float32."""
    inputs = jnp.asarray(inputs)            # native dtype kept; upcast happens in-kernel
    B, L = inputs.shape
    target, t_row = _normalize_aux(target, B, L)
    m_row = True
    if mask is not None:
        mask, m_row = _normalize_aux(mask, B, L)

    # ---- tile selection, sized from ACTUAL itemsizes of per-row streamed operands ----
    row_isz = inputs.dtype.itemsize
    if not t_row:
        row_isz = max(row_isz, target.dtype.itemsize)
    if mask is not None and not m_row:
        row_isz = max(row_isz, mask.dtype.itemsize)

    # Split L only when even an 8-row tile of the widest operand overflows the budget.
    tl_cap = max(128, (tile_bytes // (8 * row_isz)) // 128 * 128)
    if L <= tl_cap:
        tl, nk, mask_tail = L, 1, False
    else:
        tl = tl_cap
        nk = pl.cdiv(L, tl)
        mask_tail = (L % tl) != 0

    if B <= 8:
        tb = B                                # block == full batch dim (sublane rule ok)
    else:
        tb = max(8, (tile_bytes // (tl * row_isz)) // 8 * 8)
        tb = min(tb, _round_up(B, 8))
        if B >= 16:
            # v7x has 2 TensorCores: guarantee >= 2 "parallel" batch grid steps.
            tb = min(tb, _round_up((B + 1) // 2, 8))
    nb = pl.cdiv(B, tb)

    def row_map(i, k):
        return (i, k)

    def bcast_map(i, k):
        return (0, k)

    x_spec = pl.BlockSpec((tb, tl), row_map)
    t_spec = pl.BlockSpec((1, tl), bcast_map) if t_row else pl.BlockSpec((tb, tl), row_map)
    out_spec = pl.BlockSpec((tb, 1), lambda i, k: (i, 0))

    in_specs = [x_spec, t_spec]
    args = [inputs, target]
    if mask is not None:
        m_spec = pl.BlockSpec((1, tl), bcast_map) if m_row else pl.BlockSpec((tb, tl), row_map)
        in_specs.append(m_spec)
        args.append(mask)

    kern_kw = dict(inv_l=1.0 / float(L), tl=tl, l_total=L, mask_tail=mask_tail)
    kern = (functools.partial(_kernel_mask, **kern_kw) if mask is not None
            else functools.partial(_kernel_nomask, **kern_kw))

    # VMEM: 2 pipeline buffers per input block + output (double buffered) + acc + headroom.
    in_block_bytes = tb * tl * inputs.dtype.itemsize
    in_block_bytes += (1 if t_row else tb) * tl * target.dtype.itemsize
    if mask is not None:
        in_block_bytes += (1 if m_row else tb) * tl * mask.dtype.itemsize
    vmem_bytes = 2 * in_block_bytes + 2 * tb * 4 + tb * 4 + (2 << 20)
    vmem_bytes = int(min(max(vmem_bytes, 16 << 20), 56 << 20))

    out = pl.pallas_call(
        kern,
        out_shape=jax.ShapeDtypeStruct((B, 1), jnp.float32),
        grid=(nb, nk),
        in_specs=in_specs,
        out_specs=out_spec,
        scratch_shapes=[pltpu.VMEM((tb, 1), jnp.float32)],
        compiler_params=pltpu.CompilerParams(
            dimension_semantics=("parallel", "arbitrary"),
            vmem_limit_bytes=vmem_bytes,
        ),
    )(*args)
    return out[:, 0]


def _reference(inputs, target, mask):
    x = jnp.asarray(inputs, jnp.float32)
    t = jnp.broadcast_to(jnp.asarray(target, jnp.float32), x.shape)
    loss = jnp.maximum(x, 0.0) - x * t + jnp.log1p(jnp.exp(-jnp.abs(x)))
    if mask is not None:
        loss = loss * jnp.broadcast_to(jnp.asarray(mask, jnp.float32), x.shape)
    return loss.mean(axis=1)


if __name__ == "__main__":
    key = jax.random.PRNGKey(0)
    k1, k2, k3 = jax.random.split(key, 3)

    # word2vec skip-gram style shapes: batch x (num_context + num_noise)
    B, L = 8, 128
    inputs = jax.random.normal(k1, (B, L), dtype=jnp.float32) * 2.0
    target = (jax.random.uniform(k2, (B, L)) > 0.5).astype(jnp.float32)
    mask = (jax.random.uniform(k3, (B, L)) > 0.25).astype(jnp.float32)

    out = sigmoid_bce_loss(inputs, target, mask)
    jax.block_until_ready(out)
    assert out.shape == (B,)
    assert jnp.allclose(out, _reference(inputs, target, mask), atol=1e-5, rtol=1e-5)

    # Narrow dtypes for target/mask (int8 / bool): halves-or-better HBM traffic.
    t_i8 = (jax.random.uniform(k2, (B, L)) > 0.5).astype(jnp.int8)
    m_b = jax.random.uniform(k3, (B, L)) > 0.25
    out_n = sigmoid_bce_loss(inputs, t_i8, m_b)
    jax.block_until_ready(out_n)
    assert jnp.allclose(
        out_n,
        _reference(inputs, t_i8.astype(jnp.float32), m_b.astype(jnp.float32)),
        atol=1e-5, rtol=1e-5)

    # mask=None path (2-input kernel, no all-ones stream).
    out_nm = sigmoid_bce_loss(inputs, target, None)
    jax.block_until_ready(out_nm)
    assert jnp.allclose(out_nm, _reference(inputs, target, None), atol=1e-5, rtol=1e-5)

    # Ragged batch: no padding copies, partial last batch block (rows independent).
    Br = 12
    xr = jax.random.normal(k1, (Br, L), dtype=jnp.float32)
    tr = (jax.random.uniform(k2, (Br, L)) > 0.5).astype(jnp.float32)
    mr = (jax.random.uniform(k3, (Br, L)) > 0.25).astype(jnp.float32)
    out_r = sigmoid_bce_loss(xr, tr, mr)
    jax.block_until_ready(out_r)
    assert out_r.shape == (Br,)
    assert jnp.allclose(out_r, _reference(xr, tr, mr), atol=1e-5, rtol=1e-5)

    # Shared (L,) target stays (1, L): streamed once, broadcast inside the kernel.
    t_shared = (jax.random.uniform(k2, (L,)) > 0.5).astype(jnp.float32)
    out_row = sigmoid_bce_loss(xr, t_shared, None)
    jax.block_until_ready(out_row)
    assert jnp.allclose(out_row,
                        _reference(xr, jnp.broadcast_to(t_shared, (Br, L)), None),
                        atol=1e-5, rtol=1e-5)

    # Large-L split path (accumulator over the "arbitrary" L axis) with tail masking,
    # forced via a tiny tile budget to exercise it at small shapes.
    Bs, Ls = 16, 200
    xs = jax.random.normal(k1, (Bs, Ls), dtype=jnp.float32)
    ts = (jax.random.uniform(k2, (Bs, Ls)) > 0.5).astype(jnp.float32)
    ms = (jax.random.uniform(k3, (Bs, Ls)) > 0.25).astype(jnp.float32)
    out_s = sigmoid_bce_loss(xs, ts, ms, tile_bytes=8 * 128 * 4)
    jax.block_until_ready(out_s)
    assert jnp.allclose(out_s, _reference(xs, ts, ms), atol=1e-5, rtol=1e-5)

    print("KERNEL_OK")
</pallas_src>

<mosaic_0001>
module attributes {stable_mosaic.version = 11 : i64} {
  func.func @_kernel_mask(%arg0: i32, %arg1: i32, %arg2: memref<8x128xf32, #tpu.memory_space<vmem>>, %arg3: memref<8x128xf32, #tpu.memory_space<vmem>>, %arg4: memref<8x128xf32, #tpu.memory_space<vmem>>, %arg5: memref<8x1xf32, #tpu.memory_space<vmem>>, %arg6: memref<8x1xf32, #tpu.memory_space<vmem>>) attributes {dimension_semantics = [#tpu.dimension_semantics<parallel>, #tpu.dimension_semantics<arbitrary>], iteration_bounds = array<i64: 1, 1>, scalar_prefetch = 0 : i64, scratch_operands = 1 : i64, tpu.core_type = #tpu.core_type<tc>, window_params = [{transform_indices = @transform_0, window_bounds = array<i64: 8, 128>}, {transform_indices = @transform_1, window_bounds = array<i64: 8, 128>}, {transform_indices = @transform_2, window_bounds = array<i64: 8, 128>}, {transform_indices = @transform_3, window_bounds = array<i64: 8, 1>}]} {
    %c0_i32 = arith.constant 0 : i32
    %0 = arith.cmpi eq, %arg1, %c0_i32 : i32
    %1 = arith.extui %0 : i1 to i32
    %c0_i32_0 = arith.constant 0 : i32
    %2 = arith.cmpi ne, %1, %c0_i32_0 : i32
    scf.if %2 {
      %cst_14 = arith.constant 0.000000e+00 : f32
      %25 = vector.broadcast %cst_14 : f32 to vector<8x1xf32>
      %c0_15 = arith.constant 0 : index
      %c0_16 = arith.constant 0 : index
      %26 = vector.load %arg6[%c0_15, %c0_16] : memref<8x1xf32, #tpu.memory_space<vmem>>, vector<8x1xf32>
      tpu.vector_store %arg6[%c0_15, %c0_16], %25 {strides = array<i32>} : memref<8x1xf32, #tpu.memory_space<vmem>>, vector<8x1xf32>,
    } else {
    }
    %c0 = arith.constant 0 : index
    %c0_1 = arith.constant 0 : index
    %3 = vector.load %arg2[%c0, %c0_1] : memref<8x128xf32, #tpu.memory_space<vmem>>, vector<8x128xf32>
    %c0_2 = arith.constant 0 : index
    %c0_3 = arith.constant 0 : index
    %4 = vector.load %arg3[%c0_2, %c0_3] : memref<8x128xf32, #tpu.memory_space<vmem>>, vector<8x128xf32>
    %cst = arith.constant 0.000000e+00 : f32
    %5 = vector.broadcast %cst : f32 to vector<8x128xf32>
    %6 = arith.maximumf %3, %5 : vector<8x128xf32>
    %7 = arith.mulf %3, %4 : vector<8x128xf32>
    %8 = arith.subf %6, %7 : vector<8x128xf32>
    %9 = math.absf %3 : vector<8x128xf32>
    %cst_4 = arith.constant 0.000000e+00 : f32
    %10 = vector.broadcast %cst_4 : f32 to vector<8x128xf32>
    %11 = arith.subf %10, %9 : vector<8x128xf32>
    %12 = math.exp %11 : vector<8x128xf32>
    %13 = math.log1p %12 : vector<8x128xf32>
    %14 = arith.addf %8, %13 : vector<8x128xf32>
    %c0_5 = arith.constant 0 : index
    %c0_6 = arith.constant 0 : index
    %15 = vector.load %arg4[%c0_5, %c0_6] : memref<8x128xf32, #tpu.memory_space<vmem>>, vector<8x128xf32>
    %16 = arith.mulf %14, %15 : vector<8x128xf32>
    %c0_7 = arith.constant 0 : index
    %c0_8 = arith.constant 0 : index
    %17 = vector.load %arg6[%c0_7, %c0_8] : memref<8x1xf32, #tpu.memory_space<vmem>>, vector<8x1xf32>
    %cst_9 = arith.constant dense<0.000000e+00> : vector<8xf32>
    %18 = vector.multi_reduction <add>, %16, %cst_9 [1] : vector<8x128xf32> to vector<8xf32>
    %19 = vector.shape_cast %18 : vector<8xf32> to vector<8x1xf32>
    %20 = arith.addf %17, %19 : vector<8x1xf32>
    %c0_10 = arith.constant 0 : index
    %c0_11 = arith.constant 0 : index
    %21 = vector.load %arg6[%c0_10, %c0_11] : memref<8x1xf32, #tpu.memory_space<vmem>>, vector<8x1xf32>
    tpu.vector_store %arg6[%c0_10, %c0_11], %20 {strides = array<i32>} : memref<8x1xf32, #tpu.memory_space<vmem>>, vector<8x1xf32>,
    %c0_i32_12 = arith.constant 0 : i32
    %22 = arith.cmpi eq, %arg1, %c0_i32_12 : i32
    %23 = arith.extui %22 : i1 to i32
    %c0_i32_13 = arith.constant 0 : i32
    %24 = arith.cmpi ne, %23, %c0_i32_13 : i32
    scf.if %24 {
      %c0_14 = arith.constant 0 : index
      %c0_15 = arith.constant 0 : index
      %25 = vector.load %arg6[%c0_14, %c0_15] : memref<8x1xf32, #tpu.memory_space<vmem>>, vector<8x1xf32>
      %cst_16 = arith.constant 7.812500e-03 : f32
      %26 = vector.broadcast %cst_16 : f32 to vector<8x1xf32>
      %27 = arith.mulf %25, %26 : vector<8x1xf32>
      %c0_17 = arith.constant 0 : index
      %c0_18 = arith.constant 0 : index
      %28 = vector.load %arg5[%c0_17, %c0_18] : memref<8x1xf32, #tpu.memory_space<vmem>>, vector<8x1xf32>
      tpu.vector_store %arg5[%c0_17, %c0_18], %27 {strides = array<i32>} : memref<8x1xf32, #tpu.memory_space<vmem>>, vector<8x1xf32>,
    } else {
    }
    return
  }
  func.func @transform_0(%arg0: i32, %arg1: i32) -> (i32, i32) {
    %c0_i32 = arith.constant 0 : i32
    return %arg0, %arg1 : i32, i32
  }
  func.func @transform_1(%arg0: i32, %arg1: i32) -> (i32, i32) {
    %c0_i32 = arith.constant 0 : i32
    return %arg0, %arg1 : i32, i32
  }
  func.func @transform_2(%arg0: i32, %arg1: i32) -> (i32, i32) {
    %c0_i32 = arith.constant 0 : i32
    return %arg0, %arg1 : i32, i32
  }
  func.func @transform_3(%arg0: i32, %arg1: i32) -> (i32, i32) {
    %c0_i32 = arith.constant 0 : i32
    %c0_i32_0 = arith.constant 0 : i32
    return %arg0, %c0_i32 : i32, i32
  }
}

</mosaic_0001>

<bundles_post_ra>
// kernel: tpu_custom_call.1
= control target key start
LH: loop header
LB: loop body
LE: loop exit
PB: predicated region body
PF: predicated region fallthrough
CT: control target
= control target key end

     0   :  { %8 = vsyncpa [#allocation4], 0  ;;  %s205_s0 = inlined_call_operand.hbm [shape: f32[8,128], index: 0, kind: input, shape index: {}]   ;;  %s206_s1 = inlined_call_operand.hbm [shape: f32[8,128], index: 1, kind: input, shape index: {}]   ;;  %s207_s2 = inlined_call_operand.hbm [shape: f32[8,128], index: 2, kind: input, shape index: {}]   ;;  %s208_s3 = inlined_call_operand.vmem [shape: f32[8,1], index: 3, kind: output, shape index: {}]  }
   0x1   :  { %9 = vsyncpa [#allocation6], 0  ;;  %s166_s12 = smov [#allocation5]   ;;  %s167_s14 = smov [#allocation3]  }
   0x2   :  { %s26_s13 = sshll.u32 %s166_s12, 4  ;;  %s16_s15 = sshll.u32 %s167_s14, 4  ;;  %s27_s13 = int_to_ptr.vmem [resolvable:$true] %s26_s13  ;;  %s17_s15 = int_to_ptr.vmem [resolvable:$true] %s16_s15 }
   0x3   :  { %s110_s16 = scalar_lea.vmem %s27_s13, 128  ;;  %p115_p1 = scmp.lt.s32.totalorder %s27_s13, %s27_s13 }
   0x4   :  { %p111_p0 = scmp.ne.s32.totalorder %s27_s13, %s110_s16  ;;  %p116_p2 = scmp.lt.s32.totalorder %s110_s16, %s110_s16 }
   0x6   :  { %p117_p3 = por %p116_p2, %p115_p1 }
   0x8   :  { %p118_p4 = pnand %p117_p3, %p111_p0 }
   0xa   :  { %121 = shalt.err (!%p118_p4)
}
   0xb   :  { %29 = dma.hbm_to_vmem [thread:$0]  %s206_s1, 128, %s27_s13, [#allocation6]  }
   0xc   :  { %s130_s19 = scalar_lea.vmem %s17_s15, 128  ;;  %p135_p6 = scmp.lt.s32.totalorder %s17_s15, %s17_s15 }
   0xd   :  { %p131_p5 = scmp.ne.s32.totalorder %s17_s15, %s130_s19  ;;  %p136_p7 = scmp.lt.s32.totalorder %s130_s19, %s130_s19 }
   0xf   :  { %p137_p8 = por %p136_p7, %p135_p6 }
  0x11   :  { %p138_p9 = pnand %p137_p8, %p131_p5 }
  0x13   :  { %141 = shalt.err (!%p138_p9)
}
  0x14   :  { %19 = dma.hbm_to_vmem [thread:$0]  %s205_s0, 128, %s17_s15, [#allocation4]  }
  0x15   :  { %s168_s22 = smov [#allocation7]  }
  0x16   :  { %s36_s23 = sshll.u32 %s168_s22, 4  ;;  %s37_s23 = int_to_ptr.vmem [resolvable:$true] %s36_s23 }
  0x17   :  { %s150_s24 = scalar_lea.vmem %s37_s23, 128  ;;  %p155_p11 = scmp.lt.s32.totalorder %s37_s23, %s37_s23 }
  0x18   :  { %p151_p10 = scmp.ne.s32.totalorder %s37_s23, %s150_s24  ;;  %p156_p12 = scmp.lt.s32.totalorder %s150_s24, %s150_s24 }
  0x1a   :  { %p157_p13 = por %p156_p12, %p155_p11 }
  0x1c   :  { %p158_p0 = pnand %p157_p13, %p151_p10 }
  0x1e   :  { %161 = shalt.err (!%p158_p0)
}
  0x1f   :  { %39 = dma.hbm_to_vmem [thread:$0]  %s207_s2, 128, %s37_s23, [#allocation6]  }
  0x20   :  { %162 = dma.done.wait [#allocation4], 128  }
  0x21   :  { %163 = vsyncadd [#allocation4], 4294967168 }
  0x22   :  { %164 = dma.done.wait [#allocation6], 256  }
  0x23   :  { %165 = vsyncadd [#allocation6], 4294967040  ;;  %vm53_vm0 = vcmask 7168   ;;  %v169_v0 = vmov 0.0   ;;  %v55_v1 = vld [vmem:[#allocation3] sm:$0xff]  ;;  %v56_v8 = vld [vmem:[#allocation5] sm:$0xff] }
  0x24   :  { %54 = vst.msk [vmem:[#allocation2] sm:$0xff] %vm53_vm0, %v169_v0  ;;  %v60_v2 = vand.u32 2147483647, %v55_v1  ;;  %v57_v10 = vmax.f32 %v55_v1, 0.0  ;;  %v58_v11 = vmul.f32 %v56_v8, %v55_v1  ;;  %v74_v18 = vld [vmem:[#allocation7] sm:$0xff] }
  0x26   :  { %v61_v3 = vsub.f32 0.0, %v60_v2  ;;  %v59_v15 = vsub.f32 %v57_v10, %v58_v11 }
  0x28   :  { %v62_v4 = vmul.f32 1.442695, %v61_v3 }
  0x2a   :  { %98 = vpow2.f32 %v62_v4 }
  0x2b   :  { %v76_v21 = vld [vmem:[#allocation2] sm:$0xff] }
  0x37   :  { %v99_v5 = vpop.eup %98 }
  0x38   :  { %v64_v6 = vadd.f32 1.0, %v99_v5  ;;  %v67_v7 = vmul.f32 -0.5, %v99_v5  ;;  %v70_v12 = vand.u32 2147483647, %v99_v5 }
  0x3a   :  { %100 = vlog2.f32 %v64_v6  ;;  %v68_v9 = vadd.f32 1.0, %v67_v7  ;;  %vm71_vm1 = vcmp.lt.f32.partialorder %v70_v12, 0.0004427343 }
  0x3c   :  { %v69_v13 = vmul.f32 %v99_v5, %v68_v9 }
  0x47   :  { %v101_v14 = vpop.eup %100 }
  0x48   :  { %v66_v16 = vmul.f32 0.6931472, %v101_v14 }
  0x4a   :  { %v72_v17 = vsel %vm71_vm1, %v69_v13, %v66_v16 }
  0x4b   :  { %v73_v19 = vadd.f32 %v72_v17, %v59_v15 }
  0x4d   :  { %v75_v20 = vmul.f32 %v74_v18, %v73_v19 }
  0x4f   :  { %77 = vadd.xlane.f32.xlu0 %v75_v20 }
  0xd8   :  { %v78_v22 = vpop.xlane.xlu0 %77 }
  0xd9   :  { %v79_v23 = vadd.f32 %v78_v22, %v76_v21 }
  0xdb   :  { %81 = vst.msk [vmem:[#allocation2] sm:$0xff] %vm53_vm0, %v79_v23 }
  0xe2   :  { %v85_v24 = vld [vmem:[#allocation2] sm:$0xff] }
  0xe3   :  { %v86_v25 = vmul.f32 0.0078125, %v85_v24 }
  0xe5   :  { %87 = vst.msk [vmem:[%s208_s3] sm:$0xff] %vm53_vm0, %v86_v25 }
  0xe6   :  { %92 = vsyncpa [#allocation4], 1 }
  0xe7   :  { %93 = vsyncpa [#allocation6], 1 }

</bundles_post_ra>
